<compile_context>
chip_gen: v5e
topology: v5e:2x2
jax: 0.10.0
libtpu: 0.0.40
codegen_flags: <defaults>
</compile_context>

<pallas_src>
import jax
import jax.numpy as jnp
from jax.experimental import pallas as pl
from jax.experimental.pallas import tpu as pltpu

# packed-parameter layout: column offsets inside the (hidden, N_COLS) slab
K_PAD = 8            # state_dim zero-padded to one full sublane group
B1_COL = K_PAD       # 8  : fc1 bias
W2_COL = K_PAD + 1   # 9  : fc2 weight (as a column)
B2_COL = K_PAD + 2   # 10 : fc2 bias (broadcast down the column)
N_COLS = 16


def value_net_kernel(xt_ref, p_ref, o_ref):
    # xt_ref: (K_PAD, TB)      - state features on sublanes, batch on lanes
    # p_ref : (hidden, N_COLS) - [ w1^T (padded to 8 cols) | b1 | w2 | b2 | 0 ]
    # o_ref : (1, TB)          - lane-dense value output
    w1t = p_ref[:, 0:K_PAD]                  # (hidden, 8)
    b1 = p_ref[:, B1_COL:B1_COL + 1]         # (hidden, 1)
    w2 = p_ref[:, W2_COL:W2_COL + 1]         # (hidden, 1)
    b2 = p_ref[0:1, B2_COL:B2_COL + 1]       # (1, 1)

    # fc1 on the MXU: (hidden, 8) @ (8, TB); batch spans the full lane width.
    h = jnp.dot(w1t, xt_ref[...], preferred_element_type=jnp.float32) + b1
    h = jnp.maximum(h, 0.0)                  # ReLU on the VPU

    # fc2: VPU multiply + cross-sublane (XLU) reduction — replaces the N=1 matmul.
    o_ref[...] = jnp.sum(h * w2, axis=0, keepdims=True) + b2


def value_net_forward(x, params):
    """x: (B, state_dim) f32; params: packed (hidden, N_COLS). Returns (B, 1) f32."""
    B, state_dim = x.shape
    hidden = params.shape[0]

    # lane-dense batch tile: one lane width for tiny batches, 512 when big.
    TB = min(512, 128 * pl.cdiv(B, 128))
    B_pad = TB * pl.cdiv(B, TB)

    # transpose + zero-pad in the wrapper: features on sublanes (padded to 8),
    # batch on lanes. Zero padding contributes nothing to the contraction.
    xt = jnp.zeros((K_PAD, B_pad), jnp.float32).at[:state_dim, :B].set(x.T)

    out = pl.pallas_call(
        value_net_kernel,
        out_shape=jax.ShapeDtypeStruct((1, B_pad), jnp.float32),
        grid_spec=pltpu.PrefetchScalarGridSpec(
            num_scalar_prefetch=0,
            grid=(B_pad // TB,),
            in_specs=[
                pl.BlockSpec((K_PAD, TB), lambda i: (0, i)),       # x tile
                pl.BlockSpec((hidden, N_COLS), lambda i: (0, 0)),  # params (resident)
            ],
            out_specs=pl.BlockSpec((1, TB), lambda i: (0, i)),
        ),
        compiler_params=pltpu.CompilerParams(
            dimension_semantics=("parallel",)),  # shards batch tiles across TCs (v7x)
    )(xt, params)

    return out[0, :B].reshape(B, 1)


def init_value_net_params(key, state_dim, hidden_dim):
    """PyTorch nn.Linear-style init: U[-1/sqrt(fan_in), +1/sqrt(fan_in)]."""
    k1, k2, k3, k4 = jax.random.split(key, 4)
    bound1 = 1.0 / jnp.sqrt(state_dim)
    bound2 = 1.0 / jnp.sqrt(hidden_dim)
    w1 = jax.random.uniform(k1, (state_dim, hidden_dim), jnp.float32, -bound1, bound1)
    b1 = jax.random.uniform(k2, (hidden_dim,), jnp.float32, -bound1, bound1)
    w2 = jax.random.uniform(k3, (hidden_dim,), jnp.float32, -bound2, bound2)
    b2 = jax.random.uniform(k4, (), jnp.float32, -bound2, bound2)
    return w1, b1, w2, b2


def pack_params(w1, b1, w2, b2):
    """Pack (w1, b1, w2, b2) into one (hidden, N_COLS) slab -> single DMA."""
    state_dim, hidden = w1.shape
    p = jnp.zeros((hidden, N_COLS), jnp.float32)
    p = p.at[:, :state_dim].set(w1.T)   # w1^T, zero-padded out to K_PAD columns
    p = p.at[:, B1_COL].set(b1)
    p = p.at[:, W2_COL].set(w2)
    p = p.at[:, B2_COL].set(b2)         # scalar broadcast down the column
    return p


if __name__ == "__main__":
    state_dim = 4      # CartPole-v1 observation dim
    hidden_dim = 128
    batch = 2

    key = jax.random.PRNGKey(0)
    k_params, k_x, k_x2 = jax.random.split(key, 3)

    w1, b1, w2, b2 = init_value_net_params(k_params, state_dim, hidden_dim)
    params = pack_params(w1, b1, w2, b2)

    def reference(xv):
        return jnp.maximum(xv @ w1 + b1, 0.0) @ w2.reshape(hidden_dim, 1) + b2

    # small batch (single 128-lane tile, grid=(1,))
    x = jax.random.normal(k_x, (batch, state_dim), jnp.float32)
    out = jax.block_until_ready(value_net_forward(x, params))
    assert out.shape == (batch, 1)
    assert jnp.allclose(out, reference(x), atol=1e-5, rtol=1e-5)

    # larger batch exercising the batch grid (TB=512, grid=(2,)) + padding slice-off
    x_big = jax.random.normal(k_x2, (1000, state_dim), jnp.float32)
    out_big = jax.block_until_ready(value_net_forward(x_big, params))
    assert out_big.shape == (1000, 1)
    assert jnp.allclose(out_big, reference(x_big), atol=1e-5, rtol=1e-5)

    print("KERNEL_OK")
</pallas_src>

<mosaic_0001>
module attributes {stable_mosaic.version = 11 : i64} {
  func.func @value_net_kernel(%arg0: i32, %arg1: memref<8x128xf32, #tpu.memory_space<vmem>>, %arg2: memref<128x16xf32, #tpu.memory_space<vmem>>, %arg3: memref<1x128xf32, #tpu.memory_space<vmem>>) attributes {dimension_semantics = [#tpu.dimension_semantics<parallel>], iteration_bounds = array<i64: 1>, scalar_prefetch = 0 : i64, scratch_operands = 0 : i64, tpu.core_type = #tpu.core_type<tc>, window_params = [{transform_indices = @transform_0, window_bounds = array<i64: 8, 128>}, {pipeline_mode = #tpu.pipeline_mode<synchronous>, transform_indices = @transform_1, window_bounds = array<i64: 128, 16>}, {transform_indices = @transform_2, window_bounds = array<i64: 1, 128>}]} {
    %c0 = arith.constant 0 : index
    %c0_0 = arith.constant 0 : index
    %0 = vector.load %arg2[%c0, %c0_0] : memref<128x16xf32, #tpu.memory_space<vmem>>, vector<128x8xf32>
    %c0_1 = arith.constant 0 : index
    %c8 = arith.constant 8 : index
    %1 = vector.load %arg2[%c0_1, %c8] : memref<128x16xf32, #tpu.memory_space<vmem>>, vector<128x1xf32>
    %c0_2 = arith.constant 0 : index
    %c9 = arith.constant 9 : index
    %2 = vector.load %arg2[%c0_2, %c9] : memref<128x16xf32, #tpu.memory_space<vmem>>, vector<128x1xf32>
    %c0_3 = arith.constant 0 : index
    %c10 = arith.constant 10 : index
    %3 = vector.load %arg2[%c0_3, %c10] : memref<128x16xf32, #tpu.memory_space<vmem>>, vector<1x1xf32>
    %c0_4 = arith.constant 0 : index
    %c0_5 = arith.constant 0 : index
    %4 = vector.load %arg1[%c0_4, %c0_5] : memref<8x128xf32, #tpu.memory_space<vmem>>, vector<8x128xf32>
    %cst = arith.constant dense<0.000000e+00> : vector<128x128xf32>
    %5 = tpu.matmul %0, %4, %cst {dimension_numbers = #tpu.dot_dimension_numbers<[1], [0], [0], [1], [0, 0, 1, 1], [], []>} : vector<128x8xf32>, vector<8x128xf32>, vector<128x128xf32> -> vector<128x128xf32>
    %6 = vector.broadcast %1 : vector<128x1xf32> to vector<128x128xf32>
    %7 = arith.addf %5, %6 : vector<128x128xf32>
    %cst_6 = arith.constant 0.000000e+00 : f32
    %8 = vector.broadcast %cst_6 : f32 to vector<128x128xf32>
    %9 = arith.maximumf %7, %8 : vector<128x128xf32>
    %10 = vector.broadcast %2 : vector<128x1xf32> to vector<128x128xf32>
    %11 = arith.mulf %9, %10 : vector<128x128xf32>
    %cst_7 = arith.constant dense<0.000000e+00> : vector<128xf32>
    %12 = vector.multi_reduction <add>, %11, %cst_7 [0] : vector<128x128xf32> to vector<128xf32>
    %13 = vector.shape_cast %12 : vector<128xf32> to vector<1x128xf32>
    %14 = vector.broadcast %3 : vector<1x1xf32> to vector<1x128xf32>
    %15 = arith.addf %13, %14 : vector<1x128xf32>
    %c0_8 = arith.constant 0 : index
    %c0_9 = arith.constant 0 : index
    %16 = vector.load %arg3[%c0_8, %c0_9] : memref<1x128xf32, #tpu.memory_space<vmem>>, vector<1x128xf32>
    tpu.vector_store %arg3[%c0_8, %c0_9], %15 {strides = array<i32>} : memref<1x128xf32, #tpu.memory_space<vmem>>, vector<1x128xf32>,
    return
  }
  func.func @transform_0(%arg0: i32) -> (i32, i32) {
    %c0_i32 = arith.constant 0 : i32
    %c0_i32_0 = arith.constant 0 : i32
    return %c0_i32, %arg0 : i32, i32
  }
  func.func @transform_1(%arg0: i32) -> (i32, i32) {
    %c0_i32 = arith.constant 0 : i32
    %c0_i32_0 = arith.constant 0 : i32
    %c0_i32_1 = arith.constant 0 : i32
    return %c0_i32, %c0_i32_0 : i32, i32
  }
  func.func @transform_2(%arg0: i32) -> (i32, i32) {
    %c0_i32 = arith.constant 0 : i32
    %c0_i32_0 = arith.constant 0 : i32
    return %c0_i32, %arg0 : i32, i32
  }
}

</mosaic_0001>

<bundles_post_ra>
// kernel: tpu_custom_call.1
= control target key start
LH: loop header
LB: loop body
LE: loop exit
PB: predicated region body
PF: predicated region fallthrough
CT: control target
= control target key end

     0   :  { %v404_v1 = vmov 8   ;;  %vm110_vm0 = vcmask 64512   ;;  %s521_s0 = inlined_call_operand.vmem [shape: f32[8,128], index: 0, kind: input, shape index: {}]   ;;  %s522_s1 = inlined_call_operand.vmem [shape: f32[128,16], index: 1, kind: input, shape index: {}]   ;;  %s523_s2 = inlined_call_operand.hbm [shape: f32[1,128], index: 2, kind: output, shape index: {}]  }
   0x1   :  { %v29_v0 = vld [vmem:[%s521_s0] sm:$0xff]  ;;  %373 = vset.pattern.permute.xlu2 %v404_v1  ;;  %372 = vset.pattern.permute.xlu1 %v404_v1  ;;  %v14_v5 = vld [vmem:[%s522_s1 + $0x10] sm:$0xff] }
   0x2   :  { %v429_v2 = vld [vmem:[%s522_s1 + $0x40] sm:$0xff]  ;;  %371 = vset.pattern.permute.xlu0 %v404_v1  ;;  %158 = vmatpush.msra.mxu0 %v29_v0 }
   0x3   :  { %v434_v3 = vld [vmem:[%s522_s1 + $0x60] sm:$0xff]  ;;  %364 = vmatpush.msra.mxu1 %v29_v0  ;;  %365 = vmatpush.msra.mxu2 %v29_v0 }
   0x4   :  { %v16_v4 = vld [vmem:[%s522_s1 + $0x20] sm:$0xff]  ;;  %366 = vmatpush.msra.mxu3 %v29_v0  ;;  %356 = vmatmul.msk.f32.vlgmr.msra.gmra.mxu2 %vm110_vm0, %v429_v2 }
   0x5   :  { %v12_v6 = vld [vmem:[%s522_s1] sm:$0xff]  ;;  %360 = vmatmul.msk.f32.vlgmr.msra.gmra.mxu3 %vm110_vm0, %v434_v3  ;;  %52 = vperm.xlu2 %373, %v16_v4  }
   0x6   :  { %7 = vsyncpa [#allocation3], 0  ;;  %352 = vmatmul.msk.f32.vlgmr.msra.gmra.mxu1 %vm110_vm0, %v16_v4  ;;  %42 = vperm.xlu1 %372, %v14_v5   ;;  %v21_v7 = vld [vmem:[%s522_s1 + $0x48] sm:$0xff]  ;;  %v15_v10 = vld [vmem:[%s522_s1 + $0x18] sm:$0xff]  ;;  %v405_v18 = vmov 9   ;;  %v406_v20 = vmov 10  }
   0x7   :  { %32 = vperm.xlu0 %371, %v12_v6   ;;  %348 = vmatmul.msk.f32.vlgmr.msra.gmra.mxu0 %vm110_vm0, %v12_v6  ;;  %v25_v8 = vld [vmem:[%s522_s1 + $0x68] sm:$0xff]  ;;  %v22_v12 = vld [vmem:[%s522_s1 + $0x50] sm:$0xff]  ;;  %v19_v15 = vld [vmem:[%s522_s1 + $0x38] sm:$0xff]  ;;  %s339_s18 = sshll.u32 %s523_s2, 4  ;;  %s340_s18 = int_to_ptr.hbm [resolvable:$true] %s339_s18 }
   0x8   :  { %v17_v9 = vld [vmem:[%s522_s1 + $0x28] sm:$0xff]  ;;  %v26_v13 = vld [vmem:[%s522_s1 + $0x70] sm:$0xff]  ;;  %v23_v16 = vld [vmem:[%s522_s1 + $0x58] sm:$0xff] }
   0x9   :  { %v13_v11 = vld [vmem:[%s522_s1 + $0x8] sm:$0xff]  ;;  %v18_v14 = vld [vmem:[%s522_s1 + $0x30] sm:$0xff]  ;;  %v27_v17 = vld [vmem:[%s522_s1 + $0x78] sm:$0xff] }
   0xa   :  { %v28_v19 = vld [vmem:[%s522_s1] sm:$0x1]  ;;  %s407_s1 = smov [#allocation2]  }
   0xb   :  { %s337_s16 = sshll.u32 %s407_s1, 4  ;;  %s338_s16 = int_to_ptr.vmem [resolvable:$true] %s337_s16 }
   0xc   :  { %357 = vmatmul.msk.f32.gmra.mxu2 %vm110_vm0, %v21_v7 }
   0xd   :  { %361 = vmatmul.msk.f32.gmra.mxu3 %vm110_vm0, %v25_v8  ;;  %57 = vperm.xlu2 %373, %v17_v9  }
   0xe   :  { %353 = vmatmul.msk.f32.gmra.mxu1 %vm110_vm0, %v17_v9  ;;  %47 = vperm.xlu1 %372, %v15_v10  }
   0xf   :  { %37 = vperm.xlu0 %371, %v13_v11   ;;  %349 = vmatmul.msk.f32.gmra.mxu0 %vm110_vm0, %v13_v11 }
  0x14   :  { %358 = vmatmul.msk.f32.gmra.mxu2 %vm110_vm0, %v22_v12 }
  0x15   :  { %362 = vmatmul.msk.f32.gmra.mxu3 %vm110_vm0, %v26_v13  ;;  %72 = vperm.xlu2 %373, %v429_v2  }
  0x16   :  { %354 = vmatmul.msk.f32.gmra.mxu1 %vm110_vm0, %v18_v14  ;;  %67 = vperm.xlu1 %372, %v19_v15  }
  0x17   :  { %62 = vperm.xlu0 %371, %v18_v14   ;;  %350 = vmatmul.msk.f32.gmra.mxu0 %vm110_vm0, %v14_v5 }
  0x1c   :  { %359 = vmatmul.msk.f32.gmra.mxu2 %vm110_vm0, %v23_v16 }
  0x1d   :  { %363 = vmatmul.msk.f32.gmra.mxu3 %vm110_vm0, %v27_v17  ;;  %87 = vperm.xlu2 %373, %v23_v16  }
  0x1e   :  { %355 = vmatmul.msk.f32.gmra.mxu1 %vm110_vm0, %v19_v15  ;;  %82 = vperm.xlu1 %372, %v22_v12  }
  0x1f   :  { %77 = vperm.xlu0 %371, %v21_v7   ;;  %351 = vmatmul.msk.f32.gmra.mxu0 %vm110_vm0, %v15_v10 }
  0x25   :  { %102 = vperm.xlu2 %373, %v26_v13  }
  0x26   :  { %97 = vperm.xlu1 %372, %v25_v8  }
  0x27   :  { %92 = vperm.xlu0 %371, %v434_v3  }
  0x2d   :  { %375 = vset.pattern.permute.xlu2 %v405_v18 }
  0x2e   :  { %374 = vset.pattern.permute.xlu1 %v405_v18  ;;  %229 = vperm.xlu2 %375, %v13_v11  }
  0x2f   :  { %107 = vperm.xlu0 %371, %v27_v17   ;;  %225 = vperm.xlu1 %374, %v12_v6  }
  0x36   :  { %241 = vperm.xlu2 %375, %v16_v4  }
  0x37   :  { %376 = vset.pattern.permute.xlu0 %v405_v18  ;;  %237 = vperm.xlu1 %374, %v15_v10  }
  0x38   :  { %233 = vperm.xlu0 %376, %v14_v5  }
  0x3e   :  { %249 = vperm.xlu2 %375, %v18_v14  }
  0x3f   :  { %245 = vperm.xlu1 %374, %v17_v9  }
  0x40   :  { %253 = vperm.xlu0 %376, %v19_v15  }
  0x46   :  { %261 = vperm.xlu2 %375, %v21_v7  }
  0x47   :  { %257 = vperm.xlu1 %374, %v429_v2  }
  0x48   :  { %265 = vperm.xlu0 %376, %v22_v12  }
  0x4e   :  { %273 = vperm.xlu2 %375, %v434_v3  }
  0x4f   :  { %269 = vperm.xlu1 %374, %v23_v16  }
  0x50   :  { %277 = vperm.xlu0 %376, %v25_v8  }
  0x56   :  { %285 = vperm.xlu2 %375, %v27_v17  }
  0x57   :  { %281 = vperm.xlu1 %374, %v26_v13  }
  0x58   :  { %377 = vset.pattern.permute.xlu0 %v406_v20 }
  0x59   :  { %327 = vperm.xlu0 %377, %v28_v19  }
  0x5f   :  { %v53_v21 = vpop.permute.xlu2 %52 }
  0x67   :  { %v58_v22 = vpop.permute.xlu2 %57 }
  0x6f   :  { %v73_v25 = vpop.permute.xlu2 %72 }
  0x77   :  { %v503_v28 = vpop.permute.xlu2 %87 }
  0x78   :  { %v43_v23 = vpop.permute.xlu1 %42 }
  0x79   :  { %v33_v24 = vpop.permute.xlu0 %32 }
  0x7f   :  { %v505_v32 = vpop.permute.xlu2 %102 }
  0x80   :  { %v48_v26 = vpop.permute.xlu1 %47 }
  0x81   :  { %v38_v27 = vpop.permute.xlu0 %37 }
  0x83   :  { %v172_v36 = vpop.f32.mrf.mxu1 }
  0x84   :  { %v160_v29 = vpop.f32.mrf.mxu0  ;;  %v173_v61 = vadd.f32 %v172_v36, %v53_v21 }
  0x85   :  { %v161_v43 = vadd.f32 %v160_v29, %v33_v24 }
  0x86   :  { %v212_v5 = vmax.f32 %v173_v61, 0.0 }
  0x87   :  { %v184_v41 = vpop.f32.mrf.mxu2  ;;  %v208_v49 = vmax.f32 %v161_v43, 0.0 }
  0x88   :  { %v68_v30 = vpop.permute.xlu1 %67  ;;  %v230_v37 = vpop.permute.xlu2 %229  ;;  %v185_v19 = vadd.f32 %v184_v41, %v73_v25 }
  0x89   :  { %v63_v31 = vpop.permute.xlu0 %62  ;;  %v196_v50 = vpop.f32.mrf.mxu3 }
  0x8b   :  { %v175_v42 = vpop.f32.mrf.mxu1 }
  0x8c   :  { %v163_v33 = vpop.f32.mrf.mxu0  ;;  %v176_v2 = vadd.f32 %v175_v42, %v58_v22 }
  0x8d   :  { %v164_v44 = vadd.f32 %v163_v33, %v38_v27  ;;  %v216_v27 = vmax.f32 %v185_v19, 0.0 }
  0x8e   :  { %v213_v11 = vmax.f32 %v176_v2, 0.0 }
  0x8f   :  { %v209_v51 = vmax.f32 %v164_v44, 0.0  ;;  %v187_v53 = vpop.f32.mrf.mxu2 }
  0x90   :  { %v83_v34 = vpop.permute.xlu1 %82  ;;  %v242_v46 = vpop.permute.xlu2 %241 }
  0x91   :  { %v78_v35 = vpop.permute.xlu0 %77  ;;  %v289_v57 = vmul.f32 %v230_v37, %v209_v51  ;;  %v199_v6 = vpop.f32.mrf.mxu3  ;;  %v292_v12 = vmul.f32 %v242_v46, %v212_v5 }
  0x93   :  { %v178_v54 = vpop.f32.mrf.mxu1 }
  0x94   :  { %v166_v40 = vpop.f32.mrf.mxu0  ;;  %v179_v7 = vadd.f32 %v178_v54, %v63_v31 }
  0x95   :  { %v167_v52 = vadd.f32 %v166_v40, %v43_v23  ;;  %v188_v23 = vadd.f32 %v187_v53, %v78_v35 }
  0x96   :  { %v214_v15 = vmax.f32 %v179_v7, 0.0 }
  0x97   :  { %v210_v58 = vmax.f32 %v167_v52, 0.0  ;;  %v190_v9 = vpop.f32.mrf.mxu2  ;;  %v217_v37 = vmax.f32 %v188_v23, 0.0 }
  0x98   :  { %v507_v38 = vpop.permute.xlu1 %97  ;;  %v250_v1 = vpop.permute.xlu2 %249  ;;  %v191_v40 = vadd.f32 %v190_v9, %v83_v34 }
  0x99   :  { %v509_v39 = vpop.permute.xlu0 %92  ;;  %v294_v20 = vmul.f32 %v250_v1, %v214_v15  ;;  %v202_v29 = vpop.f32.mrf.mxu3  ;;  %v200_v53 = vadd.f32 %v199_v6, %v507_v38 }
  0x9a   :  { %v197_v41 = vadd.f32 %v196_v50, %v509_v39 }
  0x9b   :  { %v181_v10 = vpop.f32.mrf.mxu1 }
  0x9c   :  { %v169_v48 = vpop.f32.mrf.mxu0  ;;  %v182_v16 = vadd.f32 %v181_v10, %v68_v30  ;;  %v220_v54 = vmax.f32 %v197_v41, 0.0 }
  0x9d   :  { %v170_v55 = vadd.f32 %v169_v48, %v48_v26 }
  0x9e   :  { %v215_v24 = vmax.f32 %v182_v16, 0.0 }
  0x9f   :  { %v211_v62 = vmax.f32 %v170_v55, 0.0  ;;  %v193_v33 = vpop.f32.mrf.mxu2 }
  0xa0   :  { %v262_v22 = vpop.permute.xlu2 %261  ;;  %v194_v30 = vadd.f32 %v193_v33, %v503_v28 }
  0xa1   :  { %v511_v45 = vpop.permute.xlu0 %107  ;;  %v226_v47 = vpop.permute.xlu1 %225  ;;  %v297_v46 = vmul.f32 %v262_v22, %v217_v37 }
  0xa2   :  { %v288_v56 = vmul.f32 %v226_v47, %v208_v49  ;;  %v218_v47 = vmax.f32 %v191_v40, 0.0  ;;  %v219_v49 = vmax.f32 %v194_v30, 0.0 }
  0xa4   :  { %v304_v63 = vadd.f32 %v289_v57, %v288_v56  ;;  %v205_v56 = vpop.f32.mrf.mxu3  ;;  %v203_v57 = vadd.f32 %v202_v29, %v505_v32 }
  0xa5   :  { %v206_v39 = vadd.f32 %v205_v56, %v511_v45 }
  0xa6   :  { %v222_v61 = vmax.f32 %v203_v57, 0.0 }
  0xa7   :  { %v223_v1 = vmax.f32 %v206_v39, 0.0 }
  0xa8   :  { %v274_v48 = vpop.permute.xlu2 %273 }
  0xa9   :  { %v238_v59 = vpop.permute.xlu1 %237 }
  0xaa   :  { %v234_v60 = vpop.permute.xlu0 %233  ;;  %v291_v3 = vmul.f32 %v238_v59, %v211_v62 }
  0xab   :  { %v290_v0 = vmul.f32 %v234_v60, %v210_v58  ;;  %v300_v58 = vmul.f32 %v274_v48, %v220_v54  ;;  %v221_v60 = vmax.f32 %v200_v53, 0.0 }
  0xad   :  { %v305_v4 = vadd.f32 %v304_v63, %v290_v0 }
  0xaf   :  { %v306_v8 = vadd.f32 %v305_v4, %v291_v3 }
  0xb0   :  { %v286_v63 = vpop.permute.xlu2 %285 }
  0xb1   :  { %v246_v13 = vpop.permute.xlu1 %245  ;;  %v307_v18 = vadd.f32 %v306_v8, %v292_v12  ;;  %v303_v3 = vmul.f32 %v286_v63, %v223_v1 }
  0xb2   :  { %v254_v14 = vpop.permute.xlu0 %253  ;;  %v293_v17 = vmul.f32 %v246_v13, %v213_v11 }
  0xb3   :  { %v295_v31 = vmul.f32 %v254_v14, %v215_v24 }
  0xb4   :  { %v308_v21 = vadd.f32 %v307_v18, %v293_v17 }
  0xb6   :  { %v309_v26 = vadd.f32 %v308_v21, %v294_v20 }
  0xb8   :  { %v310_v42 = vadd.f32 %v309_v26, %v295_v31 }
  0xb9   :  { %v258_v36 = vpop.permute.xlu1 %257 }
  0xba   :  { %v296_v43 = vmul.f32 %v258_v36, %v216_v27  ;;  %v266_v44 = vpop.permute.xlu0 %265 }
  0xbb   :  { %v298_v51 = vmul.f32 %v266_v44, %v218_v47 }
  0xbc   :  { %v311_v25 = vadd.f32 %v310_v42, %v296_v43 }
  0xbe   :  { %v312_v35 = vadd.f32 %v311_v25, %v297_v46 }
  0xc0   :  { %v313_v55 = vadd.f32 %v312_v35, %v298_v51 }
  0xc1   :  { %v270_v52 = vpop.permute.xlu1 %269 }
  0xc2   :  { %v299_v34 = vmul.f32 %v270_v52, %v219_v49  ;;  %v278_v59 = vpop.permute.xlu0 %277 }
  0xc3   :  { %v301_v62 = vmul.f32 %v278_v59, %v221_v60 }
  0xc4   :  { %v314_v28 = vadd.f32 %v313_v55, %v299_v34 }
  0xc6   :  { %v315_v50 = vadd.f32 %v314_v28, %v300_v58 }
  0xc8   :  { %v316_v2 = vadd.f32 %v315_v50, %v301_v62 }
  0xc9   :  { %v282_v0 = vpop.permute.xlu1 %281 }
  0xca   :  { %v302_v38 = vmul.f32 %v282_v0, %v222_v61 }
  0xcb   :  { %v328_v10 = vpop.permute.xlu0 %327 }
  0xcc   :  { %v317_v4 = vadd.f32 %v316_v2, %v302_v38 }
  0xce   :  { %v318_v5 = vadd.f32 %v317_v4, %v303_v3 }
  0xd0   :  { %v319_v6 = vrot.slane %v318_v5, 4 }
  0xd2   :  { %v320_v7 = vadd.f32 %v319_v6, %v318_v5 }
  0xd4   :  { %v321_v32 = vrot.slane %v320_v7, 2 }
  0xd6   :  { %v322_v8 = vadd.f32 %v321_v32, %v320_v7 }
  0xd8   :  { %v323_v9 = vrot.slane %v322_v8, 1 }
  0xda   :  { %v324_v45 = vadd.f32 %v323_v9, %v322_v8 }
  0xdc   :  { %v330_v11 = vadd.f32 %v328_v10, %v324_v45 }
  0xde   :  { %331 = vst [vmem:[#allocation2] sm:$0x1] %v330_v11 }
  0xdf   :  { %342 = dma.vmem_to_hbm [thread:$0]  %s338_s16, 16, %s340_s18, [#allocation3]  }
  0xe0   :  { %402 = dma.done.wait [#allocation3], 16  }
  0xe1   :  { %403 = vsyncadd [#allocation3], 4294967280 }
  0xe2   :  { %347 = vsyncpa [#allocation3], 1 }

</bundles_post_ra>
